<compile_context>
chip_gen: v7x
topology: tpu7x:2x2x1
jax: 0.10.0
libtpu: 0.0.40
codegen_flags: <defaults>
</compile_context>

<pallas_src>
import functools

import jax
import jax.numpy as jnp
from jax.experimental import pallas as pl
from jax.experimental.pallas import tpu as pltpu


# ------------------------------- helpers ------------------------------------

def _round_up(x: int, m: int) -> int:
    return ((x + m - 1) // m) * m


# ----------------------------- Pallas kernel --------------------------------

def _mlp_kernel(x_ref, w_ref, b_ref, o_ref, *, layer_dims):
    """Fused MLP over one batch tile.

      x_ref : [TN, K_0]            (VMEM, f32)
      w_ref : [L, K_max, N_max]    (VMEM, bf16 or f32, pre-transposed+padded)
      b_ref : [L, N_max]           (VMEM, f32)
      o_ref : [TN, N_{L-1}]        (VMEM, lane-dense)

    layer_dims = ((K_0, N_0), ..., (K_{L-1}, N_{L-1})) padded per-layer dims.
    """
    num_layers = len(layer_dims)
    bf16_weights = w_ref.dtype == jnp.bfloat16

    h = x_ref[...]                                   # f32 activations
    for i, (k_i, n_i) in enumerate(layer_dims):      # unrolled at trace time
        w = w_ref[i, :k_i, :n_i]                     # static index + slices
        b = b_ref[i:i + 1, :n_i]                     # [1, n_i], f32
        if bf16_weights:
            # bf16 operands, f32 accumulate: MXU-native on v5e/v6e/v7x.
            y = jnp.dot(h.astype(jnp.bfloat16), w,
                        preferred_element_type=jnp.float32)
        else:
            # True-f32 path (multiple MXU passes); only for bit-accuracy.
            y = jnp.dot(h, w, preferred_element_type=jnp.float32,
                        precision=jax.lax.Precision.HIGHEST)
        y = y + b                                    # f32 VPU (v5e-safe)
        if i != num_layers - 1:
            y = jnp.maximum(y, 0.0)
        h = y
    o_ref[...] = h.astype(o_ref.dtype)


# ------------------------------ forward glue ---------------------------------

@functools.partial(jax.jit,
                   static_argnames=("layer_dims", "out_channels", "tn"))
def mlp_forward(x, w_stack, b_stack, *, layer_dims, out_channels,
                tn: int | None = None):
    """Run the fused MLP.  All padding/packing was done once at init."""
    n, c_in = x.shape
    c_in_pad = layer_dims[0][0]
    c_out_pad = layer_dims[-1][1]

    # Batch tile: whole batch when tiny, otherwise ensure >=2 grid steps so
    # v7x can shard the "parallel" axis over its 2 TensorCores.
    if tn is None:
        if n <= 16:
            tn = max(8, _round_up(n, 8))
        else:
            tn = min(512, max(8, _round_up(pl.cdiv(n, 2), 8)))

    # Pad batch to a tile multiple and the input features to the padded K dim
    # (exact: the corresponding weight rows are zero).
    n_pad = _round_up(n, tn)
    if (n_pad, c_in_pad) != (n, c_in):
        x = jnp.pad(x, ((0, n_pad - n), (0, c_in_pad - c_in)))

    grid = (n_pad // tn,)

    in_specs = [
        pl.BlockSpec((tn, c_in_pad), lambda i: (i, 0)),        # x tiles stream
        # Constant index_map -> weights/biases DMA'd once, VMEM-resident.
        pl.BlockSpec(w_stack.shape, lambda i: (0, 0, 0)),
        pl.BlockSpec(b_stack.shape, lambda i: (0, 0)),
    ]
    out_specs = pl.BlockSpec((tn, c_out_pad), lambda i: (i, 0))

    # Explicit VMEM budget (v7x physical VMEM is only 64 MiB).
    param_bytes = (w_stack.size * w_stack.dtype.itemsize
                   + b_stack.size * b_stack.dtype.itemsize)
    x_tile_bytes = tn * c_in_pad * x.dtype.itemsize
    out_tile_bytes = tn * c_out_pad * x.dtype.itemsize
    act_bytes = tn * max(nd for _, nd in layer_dims) * 4
    budget = (2 * param_bytes + 2 * x_tile_bytes + 2 * out_tile_bytes
              + 4 * act_bytes)
    vmem_limit = int(min(max(2 * budget + (4 << 20), 16 << 20), 60 << 20))

    flops = 2 * n_pad * sum(k * nd for k, nd in layer_dims)
    bytes_accessed = (n_pad * c_in_pad * x.dtype.itemsize + param_bytes
                      + n_pad * c_out_pad * x.dtype.itemsize)

    kernel = functools.partial(_mlp_kernel, layer_dims=layer_dims)
    out_padded = pl.pallas_call(
        kernel,
        out_shape=jax.ShapeDtypeStruct((n_pad, c_out_pad), x.dtype),
        grid=grid,
        in_specs=in_specs,
        out_specs=out_specs,
        compiler_params=pltpu.CompilerParams(
            dimension_semantics=("parallel",),     # shard batch over TCs (v7x)
            vmem_limit_bytes=vmem_limit),
        cost_estimate=pl.CostEstimate(flops=flops, transcendentals=0,
                                      bytes_accessed=bytes_accessed),
    )(x, w_stack, b_stack)

    return out_padded[:n, :out_channels]


# ------------------------------- MLP wrapper ---------------------------------

class MLP:
    """JAX/Pallas port of GRL_SVO MLP (list of Linear layers, ReLU between)."""

    def __init__(self, num_layers, channels_list, key, use_bf16=True):
        assert len(channels_list) == num_layers + 1
        self.num_layers = num_layers
        self.out_channels = channels_list[-1]

        # Per-layer padded (K, N) dims; 128-lane quantum, exact zero padding.
        k_dims = [_round_up(c, 128) for c in channels_list[:-1]]
        n_dims = [_round_up(c, 128) for c in channels_list[1:]]
        self.layer_dims = tuple(zip(k_dims, n_dims))
        k_max, n_max = max(k_dims), max(n_dims)

        self.raw_params = []    # PyTorch-layout (w [C_out,C_in], b [C_out]) f32
        w_stack = jnp.zeros((num_layers, k_max, n_max), jnp.float32)
        b_stack = jnp.zeros((num_layers, n_max), jnp.float32)

        for i in range(num_layers):
            c_in, c_out = channels_list[i], channels_list[i + 1]
            key, wk, bk = jax.random.split(key, 3)
            bound = 1.0 / float(c_in) ** 0.5        # PyTorch-Linear-style init
            w = jax.random.uniform(wk, (c_out, c_in), jnp.float32,
                                   minval=-bound, maxval=bound)
            b = jax.random.uniform(bk, (c_out,), jnp.float32,
                                   minval=-bound, maxval=bound)
            self.raw_params.append((w, b))
            # Pre-transpose + zero-pad once (exact: padded rows/cols are 0).
            w_stack = w_stack.at[i, :c_in, :c_out].set(w.T)
            b_stack = b_stack.at[i, :c_out].set(b)

        # Pre-cast weights to bf16 ONCE at init (biases stay f32).
        self.w_stack = w_stack.astype(jnp.bfloat16) if use_bf16 else w_stack
        self.b_stack = b_stack

    def __call__(self, x):
        return mlp_forward(x, self.w_stack, self.b_stack,
                           layer_dims=self.layer_dims,
                           out_channels=self.out_channels)


# ---------------------------------- main --------------------------------------

if __name__ == "__main__":
    key = jax.random.PRNGKey(0)
    key, xk, pk = jax.random.split(key, 3)

    num_layers = 3
    channels_list = [32, 64, 64, 16]
    batch = 8

    x = jax.random.normal(xk, (batch, channels_list[0]), jnp.float32)

    # --- exact f32 path (precision=HIGHEST) ---------------------------------
    mlp_f32 = MLP(num_layers, channels_list, pk, use_bf16=False)
    out_f32 = jax.block_until_ready(mlp_f32(x))

    # Pure-JAX reference (PyTorch semantics, unpadded f32 weights).
    ref = x
    for i, (w, b) in enumerate(mlp_f32.raw_params):
        ref = ref @ w.T + b
        if i != num_layers - 1:
            ref = jnp.maximum(ref, 0.0)

    assert out_f32.shape == (batch, channels_list[-1])
    assert jnp.allclose(out_f32, ref, atol=1e-4, rtol=1e-4)

    # --- default production path: bf16 operands / f32 accumulate ------------
    mlp_bf16 = MLP(num_layers, channels_list, pk)       # same key => same params
    out_bf16 = jax.block_until_ready(mlp_bf16(x))
    assert out_bf16.shape == (batch, channels_list[-1])
    assert jnp.allclose(out_bf16, ref, atol=5e-2, rtol=5e-2)

    print("KERNEL_OK")
</pallas_src>

<mosaic_0001>
module attributes {stable_mosaic.version = 11 : i64} {
  func.func @_mlp_kernel(%arg0: i32, %arg1: memref<8x128xf32, #tpu.memory_space<vmem>>, %arg2: memref<3x128x128xf32, #tpu.memory_space<vmem>>, %arg3: memref<3x128xf32, #tpu.memory_space<vmem>>, %arg4: memref<8x128xf32, #tpu.memory_space<vmem>>) attributes {dimension_semantics = [#tpu.dimension_semantics<parallel>], iteration_bounds = array<i64: 1>, scalar_prefetch = 0 : i64, scratch_operands = 0 : i64, tpu.core_type = #tpu.core_type<tc>, window_params = [{transform_indices = @transform_0, window_bounds = array<i64: 8, 128>}, {pipeline_mode = #tpu.pipeline_mode<synchronous>, transform_indices = @transform_1, window_bounds = array<i64: 3, 128, 128>}, {pipeline_mode = #tpu.pipeline_mode<synchronous>, transform_indices = @transform_2, window_bounds = array<i64: 3, 128>}, {transform_indices = @transform_3, window_bounds = array<i64: 8, 128>}]} {
    %c0 = arith.constant 0 : index
    %c0_0 = arith.constant 0 : index
    %0 = vector.load %arg1[%c0, %c0_0] : memref<8x128xf32, #tpu.memory_space<vmem>>, vector<8x128xf32>
    %c0_1 = arith.constant 0 : index
    %c0_2 = arith.constant 0 : index
    %c0_3 = arith.constant 0 : index
    %1 = vector.load %arg2[%c0_1, %c0_2, %c0_3] : memref<3x128x128xf32, #tpu.memory_space<vmem>>, vector<1x128x128xf32>
    %2 = vector.shape_cast %1 : vector<1x128x128xf32> to vector<128x128xf32>
    %c0_4 = arith.constant 0 : index
    %c0_5 = arith.constant 0 : index
    %3 = vector.load %arg3[%c0_4, %c0_5] : memref<3x128xf32, #tpu.memory_space<vmem>>, vector<1x128xf32>
    %cst = arith.constant dense<0.000000e+00> : vector<8x128xf32>
    %4 = tpu.matmul %0, %2, %cst {dimension_numbers = #tpu.dot_dimension_numbers<[1], [0], [0], [1], [0, 0, 1, 1], [], []>, precision = #tpu.contract_precision<fp32>} : vector<8x128xf32>, vector<128x128xf32>, vector<8x128xf32> -> vector<8x128xf32>
    %5 = vector.broadcast %3 : vector<1x128xf32> to vector<8x128xf32>
    %6 = arith.addf %4, %5 : vector<8x128xf32>
    %cst_6 = arith.constant 0.000000e+00 : f32
    %7 = vector.broadcast %cst_6 : f32 to vector<8x128xf32>
    %8 = arith.maximumf %6, %7 : vector<8x128xf32>
    %c1 = arith.constant 1 : index
    %c0_7 = arith.constant 0 : index
    %c0_8 = arith.constant 0 : index
    %9 = vector.load %arg2[%c1, %c0_7, %c0_8] : memref<3x128x128xf32, #tpu.memory_space<vmem>>, vector<1x128x128xf32>
    %10 = vector.shape_cast %9 : vector<1x128x128xf32> to vector<128x128xf32>
    %c1_9 = arith.constant 1 : index
    %c0_10 = arith.constant 0 : index
    %11 = vector.load %arg3[%c1_9, %c0_10] : memref<3x128xf32, #tpu.memory_space<vmem>>, vector<1x128xf32>
    %cst_11 = arith.constant dense<0.000000e+00> : vector<8x128xf32>
    %12 = tpu.matmul %8, %10, %cst_11 {dimension_numbers = #tpu.dot_dimension_numbers<[1], [0], [0], [1], [0, 0, 1, 1], [], []>, precision = #tpu.contract_precision<fp32>} : vector<8x128xf32>, vector<128x128xf32>, vector<8x128xf32> -> vector<8x128xf32>
    %13 = vector.broadcast %11 : vector<1x128xf32> to vector<8x128xf32>
    %14 = arith.addf %12, %13 : vector<8x128xf32>
    %cst_12 = arith.constant 0.000000e+00 : f32
    %15 = vector.broadcast %cst_12 : f32 to vector<8x128xf32>
    %16 = arith.maximumf %14, %15 : vector<8x128xf32>
    %c2 = arith.constant 2 : index
    %c0_13 = arith.constant 0 : index
    %c0_14 = arith.constant 0 : index
    %17 = vector.load %arg2[%c2, %c0_13, %c0_14] : memref<3x128x128xf32, #tpu.memory_space<vmem>>, vector<1x128x128xf32>
    %18 = vector.shape_cast %17 : vector<1x128x128xf32> to vector<128x128xf32>
    %c2_15 = arith.constant 2 : index
    %c0_16 = arith.constant 0 : index
    %19 = vector.load %arg3[%c2_15, %c0_16] : memref<3x128xf32, #tpu.memory_space<vmem>>, vector<1x128xf32>
    %cst_17 = arith.constant dense<0.000000e+00> : vector<8x128xf32>
    %20 = tpu.matmul %16, %18, %cst_17 {dimension_numbers = #tpu.dot_dimension_numbers<[1], [0], [0], [1], [0, 0, 1, 1], [], []>, precision = #tpu.contract_precision<fp32>} : vector<8x128xf32>, vector<128x128xf32>, vector<8x128xf32> -> vector<8x128xf32>
    %21 = vector.broadcast %19 : vector<1x128xf32> to vector<8x128xf32>
    %22 = arith.addf %20, %21 : vector<8x128xf32>
    %c0_18 = arith.constant 0 : index
    %c0_19 = arith.constant 0 : index
    %23 = vector.load %arg4[%c0_18, %c0_19] : memref<8x128xf32, #tpu.memory_space<vmem>>, vector<8x128xf32>
    tpu.vector_store %arg4[%c0_18, %c0_19], %22 {strides = array<i32>} : memref<8x128xf32, #tpu.memory_space<vmem>>, vector<8x128xf32>,
    return
  }
  func.func @transform_0(%arg0: i32) -> (i32, i32) {
    %c0_i32 = arith.constant 0 : i32
    %c0_i32_0 = arith.constant 0 : i32
    return %arg0, %c0_i32 : i32, i32
  }
  func.func @transform_1(%arg0: i32) -> (i32, i32, i32) {
    %c0_i32 = arith.constant 0 : i32
    %c0_i32_0 = arith.constant 0 : i32
    %c0_i32_1 = arith.constant 0 : i32
    %c0_i32_2 = arith.constant 0 : i32
    return %c0_i32, %c0_i32_0, %c0_i32_1 : i32, i32, i32
  }
  func.func @transform_2(%arg0: i32) -> (i32, i32) {
    %c0_i32 = arith.constant 0 : i32
    %c0_i32_0 = arith.constant 0 : i32
    %c0_i32_1 = arith.constant 0 : i32
    return %c0_i32, %c0_i32_0 : i32, i32
  }
  func.func @transform_3(%arg0: i32) -> (i32, i32) {
    %c0_i32 = arith.constant 0 : i32
    %c0_i32_0 = arith.constant 0 : i32
    return %arg0, %c0_i32 : i32, i32
  }
}

</mosaic_0001>

<bundles_post_ra>
// kernel: mlp_forward.1
= control target key start
LH: loop header
LB: loop body
LE: loop exit
PB: predicated region body
PF: predicated region fallthrough
CT: control target
= control target key end

     0   :  { %8 = vsyncpa [#allocation3], 0  ;;  %s4430_s0 = inlined_call_operand.vmem [shape: f32[8,128], index: 0, kind: input, shape index: {}]   ;;  %s4431_s1 = inlined_call_operand.hbm [shape: f32[3,128,128], index: 1, kind: input, shape index: {}]   ;;  %s4432_s2 = inlined_call_operand.vmem [shape: f32[3,128], index: 2, kind: input, shape index: {}]   ;;  %s4433_s3 = inlined_call_operand.hbm [shape: f32[8,128], index: 3, kind: output, shape index: {}]  }
   0x1   :  { %9 = vsyncpa [#allocation4], 0  ;;  %s3494_s12 = smov [#allocation2]   ;;  %s3446_s16 = scalar_lea.hbm %s4431_s1, 6144 }
   0x2   :  { %s17_s13 = sshll.u32 %s3494_s12, 4  ;;  %p3447_p0 = scmp.ne.s32.totalorder %s4431_s1, %s3446_s16  ;;  %s18_s13 = int_to_ptr.vmem [resolvable:$true] %s17_s13 }
   0x3   :  { %p3450_p1 = scmp.lt.u32.totalorder %s3446_s16, %s4431_s1 }
   0x5   :  { %p3452_p2 = pnand %p3450_p1, %p3447_p0 }
   0x7   :  { %3455 = shalt.err (!%p3452_p2)
}
   0x8   :  { %s3456_s21 = scalar_lea.vmem %s18_s13, 6144  ;;  %p3461_p4 = scmp.lt.s32.totalorder %s18_s13, %s18_s13 }
   0x9   :  { %p3457_p3 = scmp.ne.s32.totalorder %s18_s13, %s3456_s21  ;;  %p3462_p5 = scmp.lt.s32.totalorder %s3456_s21, %s3456_s21 }
   0xb   :  { %p3463_p6 = por %p3462_p5, %p3461_p4 }
   0xd   :  { %p3464_p7 = pnand %p3463_p6, %p3457_p3 }
   0xf   :  { %3467 = shalt.err (!%p3464_p7)
}
  0x10   :  { %s3495_s22 = smov 128   ;;  %s3496_s23 = smov 8  }
  0x11   :  { %23 = dma.hbm_to_vmem [thread:$0]  %s4431_s1, 6144, %s18_s13, [#allocation3], %s3495_s22, %s3495_s22, %s3496_s23  }
  0x12   :  { %3490 = dma.done.wait [#allocation3], 6144  }
  0x13   :  { %3491 = vsyncadd [#allocation3], 4294961152  ;;  %v4450_v0 = vmov 0.0|0.0   ;;  %vm3498_vm0 = vmmov 0   ;;  %v4444_v1 = vmov 0.0   ;;  %v30_v2 = vld [vmem:[#allocation2] sm:$0xff] }
  0x14   :  { %2975 = vmatprep.subr.bf16.mxu1 %v4450_v0  ;;  %3047 = vmatprep.subr.bf16.mxu0 %v4450_v0  ;;  %v31_v3 = vld [vmem:[#allocation2 + $0x8] sm:$0xff]  ;;  %v32_v4 = vld [vmem:[#allocation2 + $0x10] sm:$0xff]  ;;  %v52_v5 = vand.u32 4294901760, %v30_v2  ;;  %v33_v7 = vld [vmem:[#allocation2 + $0x18] sm:$0xff]  ;;  %s3500_s5 = smov [#allocation5]  }
  0x15   :  { %2377 = vmatprep.mubr.msk.f32.mxu1 %vm3498_vm0, %v4444_v1  ;;  %2482 = vmatprep.mubr.msk.f32.mxu0 %vm3498_vm0, %v4444_v1  ;;  %v55_v6 = vand.u32 4294901760, %v31_v3  ;;  %v58_v8 = vand.u32 4294901760, %v32_v4  ;;  %v61_v9 = vand.u32 4294901760, %v33_v7  ;;  %v34_v10 = vld [vmem:[#allocation2 + $0x20] sm:$0xff]  ;;  %v35_v11 = vld [vmem:[#allocation2 + $0x28] sm:$0xff]  ;;  %v3547_v16 = vld [vmem:[#allocation2 + $0x30] sm:$0xff] }
  0x16   :  { %v64_v14 = vand.u32 4294901760, %v34_v10  ;;  %v67_v15 = vand.u32 4294901760, %v35_v11  ;;  %v3549_v17 = vld [vmem:[#allocation2 + $0x38] sm:$0xff]  ;;  %v70_v19 = vand.u32 4294901760, %v3547_v16  ;;  %v38_v21 = vld [vmem:[#allocation2 + $0x40] sm:$0xff]  ;;  %v39_v22 = vld [vmem:[#allocation2 + $0x48] sm:$0xff]  ;;  %v3570_v27 = vsub.f32 %v30_v2, %v52_v5 }
  0x17   :  { %v3539_v12 = vpack.c.bf16 %v55_v6, %v52_v5  ;;  %v3543_v13 = vpack.c.bf16 %v61_v9, %v58_v8  ;;  %v73_v20 = vand.u32 4294901760, %v3549_v17  ;;  %v76_v24 = vand.u32 4294901760, %v38_v21  ;;  %v29_v26 = vld [vmem:[%s4430_s0] sm:$0xff]  ;;  %v3576_v29 = vld [vmem:[#allocation2 + $0x50] sm:$0xff]  ;;  %v3594_v37 = vld [vmem:[#allocation2 + $0x60] sm:$0xff]  ;;  %s2027_s6 = sshll.u32 %s3500_s5, 4  ;;  %s2028_s6 = int_to_ptr.vmem [resolvable:$true] %s2027_s6 }
  0x18   :  { %v3553_v18 = vpack.c.bf16 %v67_v15, %v64_v14  ;;  %v79_v25 = vand.u32 4294901760, %v39_v22  ;;  %v3572_v28 = vsub.f32 %v31_v3, %v55_v6  ;;  %v3578_v30 = vld [vmem:[#allocation2 + $0x58] sm:$0xff]  ;;  %v3580_v31 = vand.u32 4294901760, %v29_v26  ;;  %v3596_v38 = vld [vmem:[#allocation2 + $0x68] sm:$0xff]  ;;  %v3615_v46 = vld [vmem:[#allocation2 + $0x70] sm:$0xff]  ;;  %s3468_s7 = scalar_lea.vmem %s2028_s6, 128  ;;  %p3473_p9 = scmp.lt.s32.totalorder %s2028_s6, %s2028_s6 }
  0x19   :  { %2977 = vmatpush3.bf16.msra.mxu1 %v3539_v12  ;;  %3049 = vmatpush3.bf16.msra.mxu0 %v3539_v12  ;;  %v3565_v23 = vpack.c.bf16 %v73_v20, %v70_v19  ;;  %v3582_v32 = vsub.f32 %v32_v4, %v58_v8  ;;  %v82_v34 = vand.u32 4294901760, %v3576_v29  ;;  %v85_v35 = vand.u32 4294901760, %v3578_v30  ;;  %v3617_v47 = vld [vmem:[#allocation2 + $0x78] sm:$0xff]  ;;  %v3648_v63 = vld [vmem:[#allocation2 + $0x80] sm:$0xff]  ;;  %v3660_v4 = vld [vmem:[#allocation2 + $0x88] sm:$0xff]  ;;  %p3469_p8 = scmp.ne.s32.totalorder %s2028_s6, %s3468_s7  ;;  %p3474_p10 = scmp.lt.s32.totalorder %s3468_s7, %s3468_s7 }
  0x1a   :  { %2978 = vmatprep.subr.bf16.mxu1 %v4450_v0  ;;  %3050 = vmatprep.subr.bf16.mxu0 %v4450_v0  ;;  %v3586_v33 = vpack.c.bf16 %v79_v25, %v76_v24  ;;  %v3590_v36 = vsub.f32 %v33_v7, %v61_v9  ;;  %v145_v39 = vand.u32 4294901760, %v3570_v27  ;;  %v152_v40 = vand.u32 4294901760, %v3572_v28  ;;  %v3673_v9 = vld [vmem:[#allocation2 + $0x90] sm:$0xff] }
  0x1b   :  { %v3600_v41 = vsub.f32 %v34_v10, %v64_v14  ;;  %v3603_v42 = vsub.f32 %v29_v26, %v3580_v31  ;;  %v3611_v43 = vpack.c.bf16 %v85_v35, %v82_v34  ;;  %v88_v44 = vand.u32 4294901760, %v3594_v37  ;;  %v3675_v10 = vld [vmem:[#allocation2 + $0x98] sm:$0xff]  ;;  %p3475_p11 = por %p3474_p10, %p3473_p9 }
  0x1c   :  { %v4446_v45 = vand.u32 4294901760, %v3596_v38  ;;  %v159_v48 = vand.u32 4294901760, %v3582_v32  ;;  %v3620_v49 = vsub.f32 %v35_v11, %v67_v15  ;;  %v146_v50 = vsub.f32 %v3570_v27, %v145_v39 }
  0x1d   :  { %2980 = vmatpush3.bf16.msra.mxu1 %v3543_v13  ;;  %3052 = vmatpush3.bf16.msra.mxu0 %v3543_v13  ;;  %v153_v51 = vsub.f32 %v3572_v28, %v152_v40  ;;  %v166_v52 = vand.u32 4294901760, %v3590_v36  ;;  %v4437_v53 = vand.u32 4294901760, %v3615_v46  ;;  %v4435_v54 = vand.u32 4294901760, %v3617_v47  ;;  %p3476_p12 = pnand %p3475_p11, %p3469_p8 }
  0x1e   :  { %2981 = vmatprep.subr.bf16.mxu1 %v4450_v0  ;;  %3053 = vmatprep.subr.bf16.mxu0 %v4450_v0  ;;  %v134_v55 = vand.u32 4294901760, %v3603_v42  ;;  %v3636_v56 = vpack.c.bf16 %v4446_v45, %v88_v44  ;;  %v3641_v57 = vsub.f32 %v3582_v32, %v159_v48  ;;  %v4441_v58 = vand.u32 4294901760, %v3600_v41 }
  0x1f   :  { %v147_v59 = vand.u32 4294901760, %v146_v50  ;;  %v154_v60 = vand.u32 4294901760, %v153_v51  ;;  %v167_v61 = vsub.f32 %v3590_v36, %v166_v52  ;;  %v4439_v62 = vand.u32 4294901760, %v3620_v49  ;;  %v3704_v51 = vld [vmem:[#allocation2 + $0xb8] sm:$0xff] }
  0x20   :  { %v3653_v2 = vsub.f32 %v3547_v16, %v70_v19  ;;  %v3658_v3 = vsub.f32 %v3549_v17, %v73_v20  ;;  %v3662_v5 = vsub.f32 %v38_v21, %v76_v24  ;;  %v3664_v6 = vsub.f32 %v39_v22, %v79_v25  ;;  %v3684_v17 = vld [vmem:[#allocation2 + $0xa0] sm:$0xff]  ;;  %v3686_v19 = vld [vmem:[#allocation2 + $0xa8] sm:$0xff]  ;;  %v3694_v25 = vld [vmem:[#allocation2 + $0xb0] sm:$0xff] }
  0x21   :  { %2983 = vmatpush3.bf16.msra.mxu1 %v3553_v18  ;;  %3055 = vmatpush3.bf16.msra.mxu0 %v3553_v18  ;;  %v3670_v7 = vpack.c.bf16 %v4435_v54, %v4437_v53  ;;  %v135_v8 = vsub.f32 %v3603_v42, %v134_v55  ;;  %v3072_v11 = vpack.c.bf16 %v152_v40, %v145_v39  ;;  %v161_v14 = vand.u32 4294901760, %v3641_v57 }
  0x22   :  { %2984 = vmatprep.subr.bf16.mxu1 %v4450_v0  ;;  %3056 = vmatprep.subr.bf16.mxu0 %v4450_v0  ;;  %v174_v15 = vsub.f32 %v3600_v41, %v4441_v58  ;;  %v4434_v16 = vand.u32 4294901760, %v3648_v63  ;;  %v3000_v20 = vpack.c.bf16 %v154_v60, %v147_v59  ;;  %v168_v21 = vand.u32 4294901760, %v167_v61 }
  0x23   :  { %v181_v22 = vsub.f32 %v3620_v49, %v4439_v62  ;;  %v4436_v24 = vand.u32 4294901760, %v3660_v4  ;;  %v187_v26 = vand.u32 4294901760, %v3653_v2  ;;  %v4438_v40 = vand.u32 4294901760, %v3673_v9 }
  0x24   :  { %v3700_v39 = vsub.f32 %v3648_v63, %v4434_v16  ;;  %v4440_v50 = vand.u32 4294901760, %v3675_v10  ;;  %v136_v57 = vand.u32 4294901760, %v135_v8  ;;  %v4442_v60 = vand.u32 4294901760, %v3684_v17 }
  0x25   :  { %2986 = vmatpush3.bf16.msra.mxu1 %v3565_v23  ;;  %3058 = vmatpush3.bf16.msra.mxu0 %v3565_v23  ;;  %v3709_v59 = vsub.f32 %v3660_v4, %v4436_v24  ;;  %v4443_v61 = vand.u32 4294901760, %v3686_v19  ;;  %v194_v16 = vand.u32 4294901760, %v3658_v3  ;;  %v3719_v54 = vsub.f32 %v3673_v9, %v4438_v40 }
  0x26   :  { %2987 = vmatprep.subr.bf16.mxu1 %v4450_v0  ;;  %3059 = vmatprep.subr.bf16.mxu0 %v4450_v0  ;;  %v3724_v8 = vsub.f32 %v3675_v10, %v4440_v50  ;;  %v4448_v24 = vand.u32 4294901760, %v3694_v25  ;;  %v3732_v53 = vsub.f32 %v3684_v17, %v4442_v60  ;;  %v4447_v62 = vand.u32 4294901760, %v3704_v51 }
  0x27   :  { %v3737_v40 = vsub.f32 %v3686_v19, %v4443_v61  ;;  %v3743_v50 = vsub.f32 %v3576_v29, %v82_v34  ;;  %v3748_v58 = vsub.f32 %v3578_v30, %v85_v35  ;;  %v3075_v60 = vpack.c.bf16 %v166_v52, %v159_v48 }
  0x28   :  { %v3755_v61 = vsub.f32 %v3694_v25, %v4448_v24  ;;  %v175_v1 = vand.u32 4294901760, %v174_v15  ;;  %v182_v45 = vand.u32 4294901760, %v181_v22  ;;  %v201_v29 = vand.u32 4294901760, %v3662_v5 }
  0x29   :  { %2989 = vmatpush3.bf16.msra.mxu1 %v3586_v33  ;;  %3061 = vmatpush3.bf16.msra.mxu0 %v3586_v33  ;;  %v3761_v34 = vsub.f32 %v3704_v51, %v4447_v62  ;;  %v3003_v30 = vpack.c.bf16 %v168_v21, %v161_v14  ;;  %v188_v35 = vsub.f32 %v3653_v2, %v187_v26  ;;  %v208_v52 = vand.u32 4294901760, %v3664_v6 }
  0x2a   :  { %2990 = vmatprep.subr.bf16.mxu1 %v4450_v0  ;;  %3062 = vmatprep.subr.bf16.mxu0 %v4450_v0  ;;  %4469 = vst [vmem:[#allocation8_spill] sm:$0xff] %v3755_v61  ;;  %v195_v48 = vsub.f32 %v3658_v3, %v194_v16  ;;  %v4471_v15 = vand.u32 4294901760, %v3596_v38  ;;  %v4472_v14 = vmov 0.0   ;;  %v4473_v21 = vand.u32 4294901760, %v3600_v41 }
  0x2b   :  { %4470 = vst [vmem:[#allocation9_spill] sm:$0xff] %v3761_v34  ;;  %v4474_v22 = vand.u32 4294901760, %v3620_v49  ;;  %v209_v62 = vsub.f32 %v3664_v6, %v208_v52  ;;  %v222_v24 = vand.u32 4294901760, %v3748_v58 }
  0x2d   :  { %2992 = vmatpush3.bf16.msra.mxu1 %v3611_v43  ;;  %3064 = vmatpush3.bf16.msra.mxu0 %v3611_v43  ;;  %v223_v61 = vsub.f32 %v3748_v58, %v222_v24 }
  0x2e   :  { %2993 = vmatprep.subr.bf16.mxu1 %v4450_v0  ;;  %3065 = vmatprep.subr.bf16.mxu0 %v4450_v0 }
  0x31   :  { %2995 = vmatpush3.bf16.msra.mxu1 %v3636_v56  ;;  %3067 = vmatpush3.bf16.msra.mxu0 %v3636_v56 }
  0x32   :  { %2996 = vmatprep.subr.bf16.mxu1 %v4450_v0  ;;  %3068 = vmatprep.subr.bf16.mxu0 %v4450_v0 }
  0x35   :  { %2998 = vmatpush3.bf16.msra.mxu1 %v3670_v7  ;;  %3070 = vmatpush3.bf16.msra.mxu0 %v3670_v7 }
  0x36   :  { %2999 = vmatprep.subr.bf16.mxu1 %v4450_v0  ;;  %3071 = vmatprep.subr.bf16.mxu0 %v4450_v0 }
  0x38   :  { %2378 = vmatmul.mubr.f32.vlgmr.msra.gmra.mrb[0].mxu1 %v136_v57  ;;  %2483 = vmatmul.mubr.f32.vlgmr.msra.gmra.mrb[0].mxu0 %v134_v55  ;;  %v3771_v55 = vsub.f32 %v3594_v37, %v88_v44  ;;  %v3078_v57 = vpack.c.bf16 %v4474_v22, %v4473_v21  ;;  %v202_v37 = vsub.f32 %v3662_v5, %v201_v29  ;;  %v215_v44 = vand.u32 4294901760, %v3743_v50 }
  0x39   :  { %3001 = vmatpush3.bf16.msra.mxu1 %v3000_v20  ;;  %3073 = vmatpush3.bf16.msra.mxu0 %v3072_v11  ;;  %v3776_v11 = vsub.f32 %v3596_v38, %v4471_v15  ;;  %v3006_v20 = vpack.c.bf16 %v182_v45, %v175_v1  ;;  %v189_v38 = vand.u32 4294901760, %v188_v35  ;;  %v196_v15 = vand.u32 4294901760, %v195_v48 }
  0x3a   :  { %3002 = vmatprep.subr.bf16.mxu1 %v4450_v0  ;;  %3074 = vmatprep.subr.bf16.mxu0 %v4450_v0  ;;  %v4475_v1 = vand.u32 4294901760, %v3615_v46  ;;  %v4476_v21 = vand.u32 4294901760, %v3617_v47  ;;  %v203_v35 = vand.u32 4294901760, %v202_v37  ;;  %v216_v48 = vsub.f32 %v3743_v50, %v215_v44 }
  0x3b   :  { %2412 = vmatprep.mubr.msk.f32.mxu1 %vm3498_vm0, %v4472_v14  ;;  %2517 = vmatprep.mubr.msk.f32.mxu0 %vm3498_vm0, %v4472_v14  ;;  %v229_v22 = vand.u32 4294901760, %v3771_v55  ;;  %v3009_v34 = vpack.c.bf16 %v196_v15, %v189_v38  ;;  %v3087_v38 = vpack.c.bf16 %v222_v24, %v215_v44 }
  0x3c   :  { %v3795_v45 = vsub.f32 %v3615_v46, %v4475_v1  ;;  %v236_v46 = vand.u32 4294901760, %v3776_v11  ;;  %v4477_v1 = vmov 0.0|0.0  }
  0x3d   :  { %3004 = vmatpush3.bf16.msra.mxu1 %v3003_v30  ;;  %3076 = vmatpush3.bf16.msra.mxu0 %v3075_v60  ;;  %v3800_v30 = vsub.f32 %v3617_v47, %v4476_v21  ;;  %v3081_v60 = vpack.c.bf16 %v194_v16, %v187_v26  ;;  %v3084_v47 = vpack.c.bf16 %v208_v52, %v201_v29  ;;  %v217_v21 = vand.u32 4294901760, %v216_v48 }
  0x3e   :  { %3005 = vmatprep.subr.bf16.mxu1 %v4450_v0  ;;  %3077 = vmatprep.subr.bf16.mxu0 %v4450_v0  ;;  %v210_v0 = vand.u32 4294901760, %v209_v62  ;;  %v230_v16 = vsub.f32 %v3771_v55, %v229_v22  ;;  %v243_v26 = vand.u32 4294901760, %v3795_v45  ;;  %v237_v62 = vsub.f32 %v3776_v11, %v236_v46 }
  0x3f   :  { %v250_v37 = vand.u32 4294901760, %v3800_v30 }
  0x40   :  { %v231_v15 = vand.u32 4294901760, %v230_v16  ;;  %v238_v52 = vand.u32 4294901760, %v237_v62  ;;  %v244_v48 = vsub.f32 %v3795_v45, %v243_v26 }
  0x41   :  { %3007 = vmatpush3.bf16.msra.mxu1 %v3006_v20  ;;  %3079 = vmatpush3.bf16.msra.mxu0 %v3078_v57  ;;  %v3012_v20 = vpack.c.bf16 %v210_v0, %v203_v35  ;;  %v224_v57 = vand.u32 4294901760, %v223_v61  ;;  %v3090_v61 = vpack.c.bf16 %v236_v46, %v229_v22  ;;  %v3093_v44 = vpack.c.bf16 %v250_v37, %v243_v26  ;;  %v709_v46 = vld [vmem:[#allocation2 + $0xf8] sm:$0xff] }
  0x42   :  { %3008 = vmatprep.subr.bf16.mxu1 %v4477_v1  ;;  %3080 = vmatprep.subr.bf16.mxu0 %v4477_v1  ;;  %v3018_v0 = vpack.c.bf16 %v238_v52, %v231_v15  ;;  %v3027_v22 = vpack.c.bf16 %v3590_v36, %v3582_v32  ;;  %v4478_v32 = vand.u32 4294901760, %v3648_v63  ;;  %v4485_v63 = vand.u32 4294901760, %v3704_v51  ;;  %v707_v51 = vld [vmem:[#allocation2 + $0xe8] sm:$0xff] }
  0x43   :  { %v3015_v29 = vpack.c.bf16 %v224_v57, %v217_v21  ;;  %v761_v16 = vand.u32 4294901760, %v709_v46  ;;  %v809_v26 = vand.u32 4294901760, %v3700_v39 }
  0x45   :  { %3010 = vmatpush3.bf16.msra.mxu1 %v3009_v34  ;;  %3082 = vmatpush3.bf16.msra.mxu0 %v3081_v60  ;;  %v251_v34 = vsub.f32 %v3800_v30, %v250_v37  ;;  %v245_v60 = vand.u32 4294901760, %v244_v48  ;;  %v810_v62 = vsub.f32 %v3700_v39, %v809_v26 }
  0x46   :  { %3011 = vmatprep.subr.bf16.mxu1 %v4477_v1  ;;  %3083 = vmatprep.subr.bf16.mxu0 %v4477_v1 }
  0x47   :  { %v252_v35 = vand.u32 4294901760, %v251_v34 }
  0x49   :  { %3013 = vmatpush3.bf16.msra.mxu1 %v3012_v20  ;;  %3085 = vmatpush3.bf16.msra.mxu0 %v3084_v47  ;;  %v3021_v24 = vpack.c.bf16 %v252_v35, %v245_v60  ;;  %v3024_v47 = vpack.c.bf16 %v3572_v28, %v3570_v27  ;;  %v3030_v27 = vpack.c.bf16 %v3620_v49, %v3600_v41  ;;  %v4480_v41 = vand.u32 4294901760, %v3673_v9  ;;  %v704_v9 = vld [vmem:[#allocation2 + $0xd0] sm:$0xff] }
  0x4a   :  { %3014 = vmatprep.subr.bf16.mxu1 %v4477_v1  ;;  %3086 = vmatprep.subr.bf16.mxu0 %v4477_v1  ;;  %v3045_v28 = vpack.c.bf16 %v3800_v30, %v3795_v45  ;;  %v708_v30 = vld [vmem:[#allocation2 + $0xf0] sm:$0xff]  ;;  %v816_v20 = vand.u32 4294901760, %v3709_v59  ;;  %v811_v60 = vand.u32 4294901760, %v810_v62 }
  0x4b   :  { %v758_v21 = vand.u32 4294901760, %v708_v30 }
  0x4c   :  { %v817_v37 = vsub.f32 %v3709_v59, %v816_v20 }
  0x4d   :  { %3016 = vmatpush3.bf16.msra.mxu1 %v3015_v29  ;;  %3088 = vmatpush3.bf16.msra.mxu0 %v3087_v38  ;;  %v3922_v57 = vpack.c.bf16 %v761_v16, %v758_v21 }
  0x4e   :  { %3017 = vmatprep.subr.bf16.mxu1 %v4477_v1  ;;  %3089 = vmatprep.subr.bf16.mxu0 %v4477_v1  ;;  %v818_v35 = vand.u32 4294901760, %v817_v37 }
  0x51   :  { %3019 = vmatpush3.bf16.msra.mxu1 %v3018_v0  ;;  %3091 = vmatpush3.bf16.msra.mxu0 %v3090_v61  ;;  %v3943_v0 = vsub.f32 %v708_v30, %v758_v21  ;;  %v3945_v61 = vsub.f32 %v709_v46, %v761_v16 }
  0x52   :  { %3020 = vmatprep.subr.bf16.mxu1 %v4477_v1  ;;  %3092 = vmatprep.subr.bf16.mxu0 %v4477_v1 }
  0x55   :  { %3022 = vmatpush3.bf16.msra.mxu1 %v3021_v24  ;;  %3094 = vmatpush3.bf16.msra.mxu0 %v3093_v44  ;;  %v823_v24 = vand.u32 4294901760, %v3719_v54  ;;  %v830_v44 = vand.u32 4294901760, %v3724_v8 }
  0x56   :  { %3023 = vmatprep.subr.bf16.mxu1 %v4477_v1  ;;  %3095 = vmatprep.subr.bf16.mxu0 %v4477_v1 }
  0x58   :  { %2413 = vmatmul.mubr.f32.vlgmr.msra.gmra.mrb[0].mxu1 %v3580_v31  ;;  %2518 = vmatmul.mubr.f32.vlgmr.msra.gmra.mrb[0].mxu0 %v3580_v31 }
  0x59   :  { %3025 = vmatpush3.bf16.msra.mxu1 %v3024_v47  ;;  %3097 = vmatpush3.bf16.msra.mxu0 %v3539_v12  ;;  %v3033_v12 = vpack.c.bf16 %v3658_v3, %v3653_v2  ;;  %v702_v3 = vld [vmem:[#allocation2 + $0xc0] sm:$0xff]  ;;  %v3950_v47 = vpack.c.bf16 %v818_v35, %v811_v60 }
  0x5a   :  { %3026 = vmatprep.subr.bf16.mxu1 %v4477_v1  ;;  %3098 = vmatprep.subr.bf16.mxu0 %v4477_v1 }
  0x5b   :  { %2447 = vmatprep.mubr.msk.f32.mxu1 %vm3498_vm0, %v4472_v14  ;;  %2552 = vmatprep.mubr.msk.f32.mxu0 %vm3498_vm0, %v4472_v14 }
  0x5d   :  { %3028 = vmatpush3.bf16.msra.mxu1 %v3027_v22  ;;  %3100 = vmatpush3.bf16.msra.mxu0 %v3543_v13  ;;  %v3036_v13 = vpack.c.bf16 %v3664_v6, %v3662_v5  ;;  %v740_v5 = vand.u32 4294901760, %v702_v3  ;;  %v824_v22 = vsub.f32 %v3719_v54, %v823_v24 }
  0x5e   :  { %3029 = vmatprep.subr.bf16.mxu1 %v4477_v1  ;;  %3101 = vmatprep.subr.bf16.mxu0 %v4477_v1 }
  0x5f   :  { %v3930_v38 = vsub.f32 %v702_v3, %v740_v5 }
  0x61   :  { %3031 = vmatpush3.bf16.msra.mxu1 %v3030_v27  ;;  %3103 = vmatpush3.bf16.msra.mxu0 %v3553_v18  ;;  %v3039_v18 = vpack.c.bf16 %v3748_v58, %v3743_v50  ;;  %v4484_v58 = vand.u32 4294901760, %v3694_v25  ;;  %v706_v50 = vld [vmem:[#allocation2 + $0xe0] sm:$0xff]  ;;  %v831_v27 = vsub.f32 %v3724_v8, %v830_v44 }
  0x62   :  { %3032 = vmatprep.subr.bf16.mxu1 %v4477_v1  ;;  %3104 = vmatprep.subr.bf16.mxu0 %v4477_v1 }
  0x63   :  { %v3903_v2 = vpack.c.bf16 %v4485_v63, %v4484_v58  ;;  %v4487_v58 = vld [vmem:[#allocation9_spill] sm:$0xff] }
  0x64   :  { %v4461_v63 = vand.u32 4294901760, %v4487_v58 }
  0x65   :  { %3034 = vmatpush3.bf16.msra.mxu1 %v3033_v12  ;;  %3106 = vmatpush3.bf16.msra.mxu0 %v3565_v23  ;;  %v3042_v23 = vpack.c.bf16 %v3776_v11, %v3771_v55  ;;  %v752_v55 = vand.u32 4294901760, %v706_v50  ;;  %v755_v11 = vand.u32 4294901760, %v707_v51  ;;  %v4464_v12 = vand.u32 4294901760, %v3732_v53 }
  0x66   :  { %3035 = vmatprep.subr.bf16.mxu1 %v4477_v1  ;;  %3107 = vmatprep.subr.bf16.mxu0 %v4477_v1 }
  0x67   :  { %v3916_v45 = vpack.c.bf16 %v755_v11, %v752_v55  ;;  %v3939_v48 = vsub.f32 %v706_v50, %v752_v55  ;;  %v3941_v34 = vsub.f32 %v707_v51, %v755_v11 }
  0x69   :  { %3037 = vmatpush3.bf16.msra.mxu1 %v3036_v13  ;;  %3109 = vmatpush3.bf16.msra.mxu0 %v3586_v33  ;;  %v4479_v33 = vand.u32 4294901760, %v3660_v4  ;;  %v703_v4 = vld [vmem:[#allocation2 + $0xc8] sm:$0xff]  ;;  %v4463_v13 = vand.u32 4294901760, %v3737_v40  ;;  %v4456_v35 = vand.u32 4294901760, %v3939_v48 }
  0x6a   :  { %3038 = vmatprep.subr.bf16.mxu1 %v4477_v1  ;;  %3110 = vmatprep.subr.bf16.mxu0 %v4477_v1  ;;  %v743_v6 = vand.u32 4294901760, %v703_v4 }
  0x6b   :  { %v3872_v36 = vpack.c.bf16 %v4479_v33, %v4478_v32  ;;  %v845_v32 = vsub.f32 %v3737_v40, %v4463_v13 }
  0x6c   :  { %v3932_v15 = vsub.f32 %v703_v4, %v743_v6 }
  0x6d   :  { %3040 = vmatpush3.bf16.msra.mxu1 %v3039_v18  ;;  %3112 = vmatpush3.bf16.msra.mxu0 %v3611_v43  ;;  %v4481_v43 = vand.u32 4294901760, %v3675_v10  ;;  %v705_v10 = vld [vmem:[#allocation2 + $0xd8] sm:$0xff]  ;;  %v825_v18 = vand.u32 4294901760, %v824_v22  ;;  %v4455_v22 = vand.u32 4294901760, %v3941_v34 }
  0x6e   :  { %3041 = vmatprep.subr.bf16.mxu1 %v4477_v1  ;;  %3113 = vmatprep.subr.bf16.mxu0 %v4477_v1 }
  0x6f   :  { %v3883_v49 = vpack.c.bf16 %v4481_v43, %v4480_v41  ;;  %v846_v43 = vand.u32 4294901760, %v845_v32 }
  0x71   :  { %3043 = vmatpush3.bf16.msra.mxu1 %v3042_v23  ;;  %3115 = vmatpush3.bf16.msra.mxu0 %v3636_v56  ;;  %v832_v23 = vand.u32 4294901760, %v831_v27 }
  0x72   :  { %3044 = vmatprep.subr.bf16.mxu1 %v4477_v1  ;;  %3116 = vmatprep.subr.bf16.mxu0 %v4477_v1 }
  0x73   :  { %v3966_v33 = vpack.c.bf16 %v832_v23, %v825_v18  ;;  %v894_v18 = vsub.f32 %v3939_v48, %v4456_v35  ;;  %v901_v23 = vsub.f32 %v3941_v34, %v4455_v22 }
  0x75   :  { %3046 = vmatpush3.bf16.msra.mxu1 %v3045_v28  ;;  %3118 = vmatpush3.bf16.msra.mxu0 %v3670_v7  ;;  %v3908_v7 = vpack.c.bf16 %v743_v6, %v740_v5  ;;  %v838_v28 = vsub.f32 %v3732_v53, %v4464_v12  ;;  %v859_v5 = vsub.f32 %v4487_v58, %v4461_v63  ;;  %v902_v32 = vand.u32 4294901760, %v901_v23 }
  0x76   :  { %3119 = vmatprep.subr.bf16.mxu1 %v4477_v1  ;;  %3263 = vmatprep.subr.bf16.mxu0 %v4477_v1  ;;  %v3189_v23 = vpack.c.bf16 %v3945_v61, %v3943_v0 }
  0x77   :  { %v839_v41 = vand.u32 4294901760, %v838_v28  ;;  %v895_v28 = vand.u32 4294901760, %v894_v18  ;;  %v3186_v18 = vpack.c.bf16 %v3941_v34, %v3939_v48 }
  0x78   :  { %2448 = vmatmul.mubr.f32.vlgmr.msra.gmra.mrb[0].mxu1 %v3603_v42  ;;  %2553 = vmatmul.mubr.f32.vlgmr.msra.gmra.mrb[0].mxu0 %v3580_v31  ;;  %v4482_v31 = vand.u32 4294901760, %v3684_v17  ;;  %v4483_v42 = vand.u32 4294901760, %v3686_v19  ;;  %v746_v17 = vand.u32 4294901760, %v704_v9  ;;  %v749_v19 = vand.u32 4294901760, %v705_v10 }
  0x79   :  { %3121 = vmatpush3.bf16.msra.mxu1 %v3872_v36  ;;  %2587 = vmatprep.mubr.msk.f32.mxu1 %vm3498_vm0, %v4472_v14  ;;  %v3150_v3 = vpack.c.bf16 %v846_v43, %v839_v41  ;;  %v4454_v41 = vand.u32 4294901760, %v3943_v0  ;;  %v4453_v43 = vand.u32 4294901760, %v3945_v61 }
  0x7a   :  { %3122 = vmatprep.subr.bf16.mxu1 %v4477_v1  ;;  %2797 = vmatprep.mubr.msk.f32.mxu0 %vm3498_vm0, %v4472_v14  ;;  %v3895_v56 = vpack.c.bf16 %v4483_v42, %v4482_v31  ;;  %v3912_v25 = vpack.c.bf16 %v749_v19, %v746_v17  ;;  %v3934_v29 = vsub.f32 %v704_v9, %v746_v17  ;;  %v4486_v31 = vld [vmem:[#allocation8_spill] sm:$0xff]  ;;  %v860_v9 = vand.u32 4294901760, %v859_v5 }
  0x7b   :  { %v3936_v52 = vsub.f32 %v705_v10, %v749_v19  ;;  %v4462_v42 = vand.u32 4294901760, %v4486_v31  ;;  %v4460_v10 = vand.u32 4294901760, %v3930_v38  ;;  %v4459_v17 = vand.u32 4294901760, %v3932_v15 }
  0x7c   :  { %v4458_v30 = vand.u32 4294901760, %v3934_v29  ;;  %v908_v5 = vsub.f32 %v3943_v0, %v4454_v41 }
  0x7d   :  { %3124 = vmatpush3.bf16.msra.mxu1 %v3883_v49  ;;  %v852_v4 = vsub.f32 %v4486_v31, %v4462_v42  ;;  %v866_v50 = vsub.f32 %v3930_v38, %v4460_v10  ;;  %v873_v51 = vsub.f32 %v3932_v15, %v4459_v17  ;;  %v4457_v46 = vand.u32 4294901760, %v3936_v52  ;;  %v1367_v10 = vld [vmem:[#allocation2 + $0x148] sm:$0xff] }
  0x7e   :  { %3125 = vmatprep.subr.bf16.mxu1 %v4477_v1  ;;  %v880_v16 = vsub.f32 %v3934_v29, %v4458_v30 }
  0x7f   :  { %v853_v6 = vand.u32 4294901760, %v852_v4  ;;  %v867_v55 = vand.u32 4294901760, %v866_v50  ;;  %v874_v11 = vand.u32 4294901760, %v873_v51  ;;  %v887_v62 = vsub.f32 %v3936_v52, %v4457_v46 }
  0x80   :  { %v881_v37 = vand.u32 4294901760, %v880_v16  ;;  %v3162_v4 = vpack.c.bf16 %v902_v32, %v895_v28  ;;  %v3174_v16 = vpack.c.bf16 %v3737_v40, %v3732_v53  ;;  %v2036_v28 = vld [vmem:[%s4432_s2] ss:$0 sm:$0xff] }
  0x81   :  { %3127 = vmatpush3.bf16.msra.mxu1 %v3895_v56  ;;  %v3153_v19 = vpack.c.bf16 %v860_v9, %v853_v6  ;;  %v3156_v21 = vpack.c.bf16 %v874_v11, %v867_v55  ;;  %v888_v60 = vand.u32 4294901760, %v887_v62  ;;  %v915_v6 = vsub.f32 %v3945_v61, %v4453_v43 }
  0x82   :  { %3128 = vmatprep.subr.bf16.mxu1 %v4477_v1  ;;  %v909_v9 = vand.u32 4294901760, %v908_v5  ;;  %v3168_v55 = vpack.c.bf16 %v3709_v59, %v3700_v39  ;;  %v3171_v11 = vpack.c.bf16 %v3724_v8, %v3719_v54  ;;  %v3177_v62 = vpack.c.bf16 %v4487_v58, %v4486_v31 }
  0x83   :  { %v3159_v27 = vpack.c.bf16 %v888_v60, %v881_v37  ;;  %v916_v50 = vand.u32 4294901760, %v915_v6  ;;  %v3180_v37 = vpack.c.bf16 %v3932_v15, %v3930_v38  ;;  %v3183_v60 = vpack.c.bf16 %v3936_v52, %v3934_v29 }
  0x84   :  { %v4488_v39 = vand.u32 4294901760, %v3732_v53  ;;  %v4489_v59 = vand.u32 4294901760, %v3737_v40  ;;  %v4491_v54 = vand.u32 4294901760, %v4487_v58  ;;  %v4494_v53 = vand.u32 4294901760, %v3934_v29 }
  0x85   :  { %3130 = vmatpush3.bf16.msra.mxu1 %v3903_v2  ;;  %v3165_v51 = vpack.c.bf16 %v916_v50, %v909_v9  ;;  %v4495_v40 = vand.u32 4294901760, %v3936_v52  ;;  %v4497_v58 = vand.u32 4294901760, %v3941_v34  ;;  %v1371_v52 = vld [vmem:[#allocation2 + $0x168] sm:$0xff]  ;;  %v1372_v34 = vld [vmem:[#allocation2 + $0x170] sm:$0xff] }
  0x86   :  { %3131 = vmatprep.subr.bf16.mxu1 %v4477_v1 }
  0x89   :  { %3133 = vmatpush3.bf16.msra.mxu1 %v3908_v7 }
  0x8a   :  { %3134 = vmatprep.subr.bf16.mxu1 %v4477_v1 }
  0x8d   :  { %3136 = vmatpush3.bf16.msra.mxu1 %v3912_v25 }
  0x8e   :  { %3137 = vmatprep.subr.bf16.mxu1 %v4477_v1 }
  0x91   :  { %3139 = vmatpush3.bf16.msra.mxu1 %v3916_v45 }
  0x92   :  { %3140 = vmatprep.subr.bf16.mxu1 %v4477_v1 }
  0x95   :  { %3142 = vmatpush3.bf16.msra.mxu1 %v3922_v57 }
  0x96   :  { %3143 = vmatprep.subr.bf16.mxu1 %v4477_v1 }
 0x14b   :  { %v393_v32 = vpop.f32.mrb[0].mxu1  ;;  %v688_v5 = vpop.f32.mrb[0].mxu0 }
 0x14c   :  { %v3407_v6 = vadd.f32 %v2036_v28, %v393_v32  ;;  %v2449_v9 = vpop.f32.mrb[1].mxu1  ;;  %v2554_v50 = vpop.f32.mrb[1].mxu0  ;;  %v1364_v28 = vld [vmem:[#allocation2 + $0x130] sm:$0xff]  ;;  %v1365_v32 = vld [vmem:[#allocation2 + $0x138] sm:$0xff] }
 0x14e   :  { %v3408_v43 = vadd.f32 %v3407_v6, %v688_v5  ;;  %v1366_v5 = vld [vmem:[#allocation2 + $0x140] sm:$0xff] }
 0x150   :  { %v692_v41 = vmax.f32 %v3408_v43, 0.0 }
 0x152   :  { %v4027_v22 = vand.u32 4294901760, %v692_v41 }
 0x154   :  { %v4030_v35 = vsub.f32 %v692_v41, %v4027_v22  ;;  %v1363_v41 = vld [vmem:[#allocation2 + $0x128] sm:$0xff] }
 0x156   :  { %v798_v46 = vand.u32 4294901760, %v4030_v35 }
 0x158   :  { %v799_v30 = vsub.f32 %v4030_v35, %v798_v46 }
 0x15a   :  { %v800_v17 = vand.u32 4294901760, %v799_v30  ;;  %v1361_v30 = vld [vmem:[#allocation2 + $0x118] sm:$0xff] }
 0x15b   :  { %v1389_v43 = vand.u32 4294901760, %v1361_v30 }
 0x15c   :  { %2588 = vmatmul.mubr.f32.vlgmr.msra.gmra.mrb[2].mxu1 %v800_v17 }
 0x15d   :  { %3145 = vmatpush3.bf16.msra.mxu1 %v3950_v47  ;;  %2622 = vmatprep.mubr.msk.f32.mxu1 %vm3498_vm0, %v4472_v14  ;;  %v1358_v47 = vld [vmem:[#allocation2 + $0x100] sm:$0xff]  ;;  %v4062_v42 = vsub.f32 %v1361_v30, %v1389_v43 }
 0x15e   :  { %3146 = vmatprep.subr.bf16.mxu1 %v4477_v1  ;;  %v1380_v17 = vand.u32 4294901760, %v1358_v47 }
 0x161   :  { %3148 = vmatpush3.bf16.msra.mxu1 %v3966_v33  ;;  %v1359_v33 = vld [vmem:[#allocation2 + $0x108] sm:$0xff] }
 0x162   :  { %3149 = vmatprep.subr.bf16.mxu1 %v4477_v1 }
 0x165   :  { %3151 = vmatpush3.bf16.msra.mxu1 %v3150_v3  ;;  %v1360_v3 = vld [vmem:[#allocation2 + $0x110] sm:$0xff] }
 0x166   :  { %3152 = vmatprep.subr.bf16.mxu1 %v4477_v1 }
 0x169   :  { %3154 = vmatpush3.bf16.msra.mxu1 %v3153_v19  ;;  %v1383_v19 = vand.u32 4294901760, %v1359_v33 }
 0x16a   :  { %3155 = vmatprep.subr.bf16.mxu1 %v4477_v1 }
 0x16b   :  { %v4052_v6 = vpack.c.bf16 %v1383_v19, %v1380_v17  ;;  %v4056_v9 = vsub.f32 %v1359_v33, %v1383_v19  ;;  %v1401_v33 = vand.u32 4294901760, %v1365_v32 }
 0x16d   :  { %3157 = vmatpush3.bf16.msra.mxu1 %v3156_v21  ;;  %v1386_v21 = vand.u32 4294901760, %v1360_v3  ;;  %3265 = vmatpush3.bf16.msra.mxu0 %v4052_v6  ;;  %v4076_v30 = vsub.f32 %v1365_v32, %v1401_v33 }
 0x16e   :  { %3158 = vmatprep.subr.bf16.mxu1 %v4477_v1  ;;  %3266 = vmatprep.subr.bf16.mxu0 %v4477_v1 }
 0x16f   :  { %v4058_v50 = vsub.f32 %v1360_v3, %v1386_v21  ;;  %v4060_v63 = vpack.c.bf16 %v1389_v43, %v1386_v21  ;;  %v1407_v3 = vand.u32 4294901760, %v1367_v10 }
 0x171   :  { %3160 = vmatpush3.bf16.msra.mxu1 %v3159_v27  ;;  %v1362_v27 = vld [vmem:[#allocation2 + $0x120] sm:$0xff]  ;;  %3268 = vmatpush3.bf16.msra.mxu0 %v4060_v63 }
 0x172   :  { %3161 = vmatprep.subr.bf16.mxu1 %v4477_v1  ;;  %3269 = vmatprep.subr.bf16.mxu0 %v4477_v1 }
 0x175   :  { %3163 = vmatpush3.bf16.msra.mxu1 %v3162_v4  ;;  %v1392_v4 = vand.u32 4294901760, %v1362_v27 }
 0x176   :  { %3164 = vmatprep.subr.bf16.mxu1 %v4477_v1 }
 0x177   :  { %v4064_v13 = vsub.f32 %v1362_v27, %v1392_v4  ;;  %v4080_v27 = vsub.f32 %v1367_v10, %v1407_v3 }
 0x179   :  { %3166 = vmatpush3.bf16.msra.mxu1 %v3165_v51  ;;  %v1395_v51 = vand.u32 4294901760, %v1363_v41 }
 0x17a   :  { %3167 = vmatprep.subr.bf16.mxu1 %v4477_v1 }
 0x17b   :  { %v4070_v12 = vsub.f32 %v1363_v41, %v1395_v51 }
 0x17c   :  { %2623 = vmatmul.mubr.f32.vlgmr.msra.gmra.mrb[2].mxu1 %v4027_v22 }
 0x17d   :  { %3169 = vmatpush3.bf16.msra.mxu1 %v3168_v55  ;;  %2657 = vmatprep.mubr.msk.f32.mxu1 %vm3498_vm0, %v4472_v14  ;;  %v4054_v55 = vsub.f32 %v1358_v47, %v1380_v17  ;;  %v1398_v47 = vand.u32 4294901760, %v1364_v28  ;;  %v1404_v17 = vand.u32 4294901760, %v1366_v5 }
 0x17e   :  { %3170 = vmatprep.subr.bf16.mxu1 %v4477_v1 }
 0x17f   :  { %v4074_v19 = vsub.f32 %v1364_v28, %v1398_v47  ;;  %v4078_v21 = vsub.f32 %v1366_v5, %v1404_v17  ;;  %v4094_v10 = vpack.c.bf16 %v1401_v33, %v1398_v47 }
 0x181   :  { %3172 = vmatpush3.bf16.msra.mxu1 %v3171_v11  ;;  %v4086_v11 = vpack.c.bf16 %v1395_v51, %v1392_v4 }
 0x182   :  { %3173 = vmatprep.subr.bf16.mxu1 %v4477_v1 }
 0x183   :  { %3271 = vmatpush3.bf16.msra.mxu0 %v4086_v11 }
 0x184   :  { %3272 = vmatprep.subr.bf16.mxu0 %v4477_v1 }
 0x185   :  { %3175 = vmatpush3.bf16.msra.mxu1 %v3174_v16  ;;  %v4102_v16 = vpack.c.bf16 %v1407_v3, %v1404_v17 }
 0x186   :  { %3176 = vmatprep.subr.bf16.mxu1 %v4477_v1 }
 0x187   :  { %3274 = vmatpush3.bf16.msra.mxu0 %v4094_v10 }
 0x188   :  { %3275 = vmatprep.subr.bf16.mxu0 %v4477_v1 }
 0x189   :  { %3178 = vmatpush3.bf16.msra.mxu1 %v3177_v62  ;;  %v3216_v62 = vpack.c.bf16 %v816_v20, %v809_v26  ;;  %v3222_v26 = vpack.c.bf16 %v4489_v59, %v4488_v39  ;;  %v4490_v20 = vand.u32 4294901760, %v4486_v31  ;;  %v4496_v31 = vand.u32 4294901760, %v3939_v48 }
 0x18a   :  { %3179 = vmatprep.subr.bf16.mxu1 %v4477_v1  ;;  %v1419_v48 = vand.u32 4294901760, %v1371_v52 }
 0x18b   :  { %3277 = vmatpush3.bf16.msra.mxu0 %v4102_v16  ;;  %v3225_v8 = vpack.c.bf16 %v4491_v54, %v4490_v20  ;;  %v1501_v20 = vand.u32 4294901760, %v4064_v13  ;;  %v1508_v54 = vand.u32 4294901760, %v4070_v12 }
 0x18c   :  { %3278 = vmatprep.subr.bf16.mxu0 %v4477_v1  ;;  %v4226_v5 = vsub.f32 %v1371_v52, %v1419_v48 }
 0x18d   :  { %3181 = vmatpush3.bf16.msra.mxu1 %v3180_v37  ;;  %v3219_v37 = vpack.c.bf16 %v830_v44, %v823_v24  ;;  %v4492_v24 = vand.u32 4294901760, %v3930_v38  ;;  %v4493_v44 = vand.u32 4294901760, %v3932_v15  ;;  %v4498_v38 = vand.u32 4294901760, %v3943_v0 }
 0x18e   :  { %3182 = vmatprep.subr.bf16.mxu1 %v4477_v1  ;;  %v4499_v15 = vand.u32 4294901760, %v3945_v61  ;;  %v1422_v0 = vand.u32 4294901760, %v1372_v34 }
 0x190   :  { %v4229_v47 = vsub.f32 %v1372_v34, %v1422_v0 }
 0x191   :  { %3184 = vmatpush3.bf16.msra.mxu1 %v3183_v60  ;;  %v3234_v60 = vpack.c.bf16 %v4497_v58, %v4496_v31  ;;  %v1515_v31 = vand.u32 4294901760, %v4074_v19  ;;  %v1522_v58 = vand.u32 4294901760, %v4076_v30 }
 0x192   :  { %3185 = vmatprep.subr.bf16.mxu1 %v4477_v1 }
 0x195   :  { %3187 = vmatpush3.bf16.msra.mxu1 %v3186_v18  ;;  %v3237_v18 = vpack.c.bf16 %v4499_v15, %v4498_v38  ;;  %v1516_v38 = vsub.f32 %v4074_v19, %v1515_v31  ;;  %v1523_v15 = vsub.f32 %v4076_v30, %v1522_v58 }
 0x196   :  { %3188 = vmatprep.subr.bf16.mxu1 %v4477_v1 }
 0x199   :  { %3190 = vmatpush3.bf16.msra.mxu1 %v3189_v23  ;;  %v1480_v23 = vand.u32 4294901760, %v4056_v9 }
 0x19a   :  { %3191 = vmatprep.subr.bf16.mxu1 %v4477_v1 }
 0x19b   :  { %v1481_v4 = vsub.f32 %v4056_v9, %v1480_v23 }
 0x19c   :  { %2658 = vmatmul.mubr.f32.vlgmr.msra.gmra.mrb[2].mxu1 %v4030_v35  ;;  %v3231_v35 = vpack.c.bf16 %v4495_v40, %v4494_v53 }
 0x19d   :  { %3193 = vmatpush3.bf16.msra.mxu1 %v3872_v36  ;;  %2692 = vmatprep.mubr.msk.f32.mxu1 %vm3498_vm0, %v4472_v14  ;;  %v1482_v3 = vand.u32 4294901760, %v1481_v4 }
 0x19e   :  { %3194 = vmatprep.subr.bf16.mxu1 %v4477_v1 }
 0x1a1   :  { %3196 = vmatpush3.bf16.msra.mxu1 %v3883_v49 }
 0x1a2   :  { %3197 = vmatprep.subr.bf16.mxu1 %v4477_v1 }
 0x1a5   :  { %3199 = vmatpush3.bf16.msra.mxu1 %v3895_v56 }
 0x1a6   :  { %3200 = vmatprep.subr.bf16.mxu1 %v4477_v1 }
 0x1a9   :  { %3202 = vmatpush3.bf16.msra.mxu1 %v3903_v2 }
 0x1aa   :  { %3203 = vmatprep.subr.bf16.mxu1 %v4477_v1 }
 0x1ad   :  { %3205 = vmatpush3.bf16.msra.mxu1 %v3908_v7 }
 0x1ae   :  { %3206 = vmatprep.subr.bf16.mxu1 %v4477_v1 }
 0x1b1   :  { %3208 = vmatpush3.bf16.msra.mxu1 %v3912_v25 }
 0x1b2   :  { %3209 = vmatprep.subr.bf16.mxu1 %v4477_v1 }
 0x1b5   :  { %3211 = vmatpush3.bf16.msra.mxu1 %v3916_v45 }
 0x1b6   :  { %3212 = vmatprep.subr.bf16.mxu1 %v4477_v1 }
 0x1b9   :  { %3214 = vmatpush3.bf16.msra.mxu1 %v3922_v57 }
 0x1ba   :  { %3215 = vmatprep.subr.bf16.mxu1 %v4477_v1 }
 0x1bc   :  { %2693 = vmatmul.mubr.f32.vlgmr.msra.gmra.mrb[2].mxu1 %v798_v46  ;;  %v3228_v46 = vpack.c.bf16 %v4493_v44, %v4492_v24  ;;  %v1502_v44 = vsub.f32 %v4064_v13, %v1501_v20 }
 0x1bd   :  { %3217 = vmatpush3.bf16.msra.mxu1 %v3216_v62  ;;  %2727 = vmatprep.mubr.msk.f32.mxu1 %vm3498_vm0, %v4472_v14  ;;  %v1487_v62 = vand.u32 4294901760, %v4058_v50 }
 0x1be   :  { %3218 = vmatprep.subr.bf16.mxu1 %v4477_v1  ;;  %v1503_v40 = vand.u32 4294901760, %v1502_v44 }
 0x1bf   :  { %v1488_v59 = vsub.f32 %v4058_v50, %v1487_v62 }
 0x1c1   :  { %3220 = vmatpush3.bf16.msra.mxu1 %v3219_v37  ;;  %v1494_v37 = vand.u32 4294901760, %v4062_v42 }
 0x1c2   :  { %3221 = vmatprep.subr.bf16.mxu1 %v4477_v1 }
 0x1c5   :  { %3223 = vmatpush3.bf16.msra.mxu1 %v3222_v26  ;;  %v1495_v26 = vsub.f32 %v4062_v42, %v1494_v37 }
 0x1c6   :  { %3224 = vmatprep.subr.bf16.mxu1 %v4477_v1 }
 0x1c7   :  { %v1496_v24 = vand.u32 4294901760, %v1495_v26 }
 0x1c9   :  { %3226 = vmatpush3.bf16.msra.mxu1 %v3225_v8  ;;  %v1489_v8 = vand.u32 4294901760, %v1488_v59  ;;  %v4467_v59 = vand.u32 4294901760, %v4226_v5 }
 0x1ca   :  { %3227 = vmatprep.subr.bf16.mxu1 %v4477_v1 }
 0x1cb   :  { %v3291_v53 = vpack.c.bf16 %v1496_v24, %v1489_v8  ;;  %v1565_v24 = vsub.f32 %v4226_v5, %v4467_v59 }
 0x1cd   :  { %3229 = vmatpush3.bf16.msra.mxu1 %v3228_v46  ;;  %v1509_v46 = vsub.f32 %v4070_v12, %v1508_v54 }
 0x1ce   :  { %3230 = vmatprep.subr.bf16.mxu1 %v4477_v1 }
 0x1d1   :  { %3232 = vmatpush3.bf16.msra.mxu1 %v3231_v35  ;;  %v1510_v35 = vand.u32 4294901760, %v1509_v46  ;;  %v1566_v46 = vand.u32 4294901760, %v1565_v24 }
 0x1d2   :  { %3233 = vmatprep.subr.bf16.mxu1 %v4477_v1 }
 0x1d5   :  { %3235 = vmatpush3.bf16.msra.mxu1 %v3234_v60  ;;  %v3294_v60 = vpack.c.bf16 %v1510_v35, %v1503_v40  ;;  %v4466_v40 = vand.u32 4294901760, %v4229_v47 }
 0x1d6   :  { %3236 = vmatprep.subr.bf16.mxu1 %v4477_v1 }
 0x1d9   :  { %3238 = vmatpush3.bf16.msra.mxu1 %v3237_v18  ;;  %v1517_v18 = vand.u32 4294901760, %v1516_v38 }
 0x1da   :  { %3239 = vmatprep.subr.bf16.mxu1 %v4477_v1 }
 0x1dc   :  { %2728 = vmatmul.mubr.f32.vlgmr.msra.gmra.mrb[2].mxu1 %v4027_v22 }
 0x1dd   :  { %3241 = vmatpush3.bf16.msra.mxu1 %v3872_v36  ;;  %2762 = vmatprep.mubr.msk.f32.mxu1 %vm3498_vm0, %v4472_v14  ;;  %v1368_v36 = vld [vmem:[#allocation2 + $0x150] sm:$0xff] }
 0x1de   :  { %3242 = vmatprep.subr.bf16.mxu1 %v4477_v1 }
 0x1e1   :  { %3244 = vmatpush3.bf16.msra.mxu1 %v3883_v49  ;;  %v1369_v49 = vld [vmem:[#allocation2 + $0x158] sm:$0xff] }
 0x1e2   :  { %3245 = vmatprep.subr.bf16.mxu1 %v4477_v1 }
 0x1e5   :  { %3247 = vmatpush3.bf16.msra.mxu1 %v3895_v56  ;;  %v1410_v56 = vand.u32 4294901760, %v1368_v36 }
 0x1e6   :  { %3248 = vmatprep.subr.bf16.mxu1 %v4477_v1 }
 0x1e7   :  { %v4220_v51 = vsub.f32 %v1368_v36, %v1410_v56  ;;  %v1524_v36 = vand.u32 4294901760, %v1523_v15  ;;  %v1572_v15 = vsub.f32 %v4229_v47, %v4466_v40 }
 0x1e9   :  { %3250 = vmatpush3.bf16.msra.mxu1 %v3903_v2  ;;  %v1413_v2 = vand.u32 4294901760, %v1369_v49  ;;  %v1543_v34 = vand.u32 4294901760, %v4220_v51 }
 0x1ea   :  { %3251 = vmatprep.subr.bf16.mxu1 %v4477_v1 }
 0x1eb   :  { %v4202_v29 = vpack.c.bf16 %v1413_v2, %v1410_v56  ;;  %v4222_v28 = vsub.f32 %v1369_v49, %v1413_v2  ;;  %v1529_v49 = vand.u32 4294901760, %v4078_v21  ;;  %v1536_v56 = vand.u32 4294901760, %v4080_v27 }
 0x1ec   :  { %v3297_v2 = vpack.c.bf16 %v1524_v36, %v1517_v18  ;;  %v1573_v36 = vand.u32 4294901760, %v1572_v15 }
 0x1ed   :  { %3253 = vmatpush3.bf16.msra.mxu1 %v3908_v7  ;;  %v1370_v7 = vld [vmem:[#allocation2 + $0x160] sm:$0xff]  ;;  %3280 = vmatpush3.bf16.msra.mxu0 %v4202_v29  ;;  %v1537_v52 = vsub.f32 %v4080_v27, %v1536_v56 }
 0x1ee   :  { %3254 = vmatprep.subr.bf16.mxu1 %v4477_v1  ;;  %3281 = vmatprep.subr.bf16.mxu0 %v4477_v1 }
 0x1f1   :  { %3256 = vmatpush3.bf16.msra.mxu1 %v3912_v25  ;;  %v1416_v25 = vand.u32 4294901760, %v1370_v7 }
 0x1f2   :  { %3257 = vmatprep.subr.bf16.mxu1 %v4477_v1 }
 0x1f3   :  { %v4224_v32 = vsub.f32 %v1370_v7, %v1416_v25  ;;  %v1530_v7 = vsub.f32 %v4078_v21, %v1529_v49 }
 0x1f5   :  { %3259 = vmatpush3.bf16.msra.mxu1 %v3916_v45  ;;  %v4206_v45 = vpack.c.bf16 %v1419_v48, %v1416_v25  ;;  %v1531_v25 = vand.u32 4294901760, %v1530_v7  ;;  %v1538_v48 = vand.u32 4294901760, %v1537_v52 }
 0x1f6   :  { %3260 = vmatprep.subr.bf16.mxu1 %v4477_v1 }
 0x1f7   :  { %3283 = vmatpush3.bf16.msra.mxu0 %v4206_v45 }
 0x1f8   :  { %3284 = vmatprep.subr.bf16.mxu0 %v4477_v1 }
 0x1f9   :  { %3262 = vmatpush3.bf16.msra.mxu1 %v3922_v57  ;;  %v1373_v57 = vld [vmem:[#allocation2 + $0x178] sm:$0xff] }
 0x1fa   :  { %v1425_v61 = vand.u32 4294901760, %v1373_v57 }
 0x1fc   :  { %2763 = vmatmul.mubr.f32.vlgmr.msra.gmra.mrb[2].mxu1 %v4027_v22  ;;  %v1473_v22 = vand.u32 4294901760, %v4054_v55  ;;  %v4212_v41 = vpack.c.bf16 %v1425_v61, %v1422_v0  ;;  %v4231_v33 = vsub.f32 %v1373_v57, %v1425_v61  ;;  %v1550_v57 = vand.u32 4294901760, %v4222_v28 }
 0x1fd   :  { %v3300_v0 = vpack.c.bf16 %v1538_v48, %v1531_v25  ;;  %v1544_v61 = vsub.f32 %v4220_v51, %v1543_v34  ;;  %v3312_v25 = vpack.c.bf16 %v4056_v9, %v4054_v55  ;;  %v3315_v48 = vpack.c.bf16 %v4062_v42, %v4058_v50 }
 0x1fe   :  { %v1474_v43 = vsub.f32 %v4054_v55, %v1473_v22  ;;  %3286 = vmatpush3.bf16.msra.mxu0 %v4212_v41  ;;  %v4465_v35 = vand.u32 4294901760, %v4231_v33  ;;  %v3333_v24 = vpack.c.bf16 %v4231_v33, %v4229_v47  ;;  %v3366_v55 = vpack.c.bf16 %v1508_v54, %v1501_v20 }
 0x1ff   :  { %3287 = vmatprep.subr.bf16.mxu0 %v4477_v1  ;;  %v1545_v4 = vand.u32 4294901760, %v1544_v61  ;;  %v3318_v61 = vpack.c.bf16 %v4070_v12, %v4064_v13  ;;  %v3369_v42 = vpack.c.bf16 %v1522_v58, %v1515_v31  ;;  %v3372_v9 = vpack.c.bf16 %v1536_v56, %v1529_v49 }
 0x200   :  { %v1475_v17 = vand.u32 4294901760, %v1474_v43  ;;  %v1551_v43 = vsub.f32 %v4222_v28, %v1550_v57  ;;  %v1579_v18 = vsub.f32 %v4231_v33, %v4465_v35  ;;  %v3375_v12 = vpack.c.bf16 %v1550_v57, %v1543_v34 }
 0x201   :  { %v4500_v13 = vand.u32 4294901760, %v4224_v32  ;;  %v4501_v50 = vand.u32 4294901760, %v4226_v5 }
 0x202   :  { %v4236_v39 = vpack.c.bf16 %v1482_v3, %v1475_v17  ;;  %v1552_v17 = vand.u32 4294901760, %v1551_v43  ;;  %v4468_v3 = vand.u32 4294901760, %v4224_v32  ;;  %v1580_v7 = vand.u32 4294901760, %v1579_v18 }
 0x203   :  { %v3321_v43 = vpack.c.bf16 %v4076_v30, %v4074_v19  ;;  %v3378_v19 = vpack.c.bf16 %v4501_v50, %v4500_v13  ;;  %v4502_v30 = vand.u32 4294901760, %v4229_v47 }
 0x204   :  { %v3303_v26 = vpack.c.bf16 %v1552_v17, %v1545_v4  ;;  %v1558_v8 = vsub.f32 %v4224_v32, %v4468_v3  ;;  %v3309_v52 = vpack.c.bf16 %v1580_v7, %v1573_v36  ;;  %v3324_v4 = vpack.c.bf16 %v4080_v27, %v4078_v21 }
 0x205   :  { %v3327_v17 = vpack.c.bf16 %v4222_v28, %v4220_v51  ;;  %v4503_v21 = vand.u32 4294901760, %v4231_v33 }
 0x206   :  { %v1559_v44 = vand.u32 4294901760, %v1558_v8  ;;  %v3330_v8 = vpack.c.bf16 %v4226_v5, %v4224_v32 }
 0x207   :  { %v3381_v27 = vpack.c.bf16 %v4503_v21, %v4502_v30 }
 0x208   :  { %v3306_v38 = vpack.c.bf16 %v1566_v46, %v1559_v44  ;;  %v2037_v44 = vld [vmem:[%s4432_s2 + $0x1] ss:$0 sm:$0xff] }
 0x2cf   :  { %v1352_v46 = vpop.f32.mrb[2].mxu1 }
 0x2d0   :  { %v3409_v15 = vadd.f32 %v2037_v44, %v1352_v46  ;;  %v2764_v18 = vpop.f32.mrb[3].mxu1 }
 0x2d2   :  { %v1356_v36 = vmax.f32 %v3409_v15, 0.0 }
 0x2d4   :  { %v4311_v7 = vand.u32 4294901760, %v1356_v36 }
 0x2d6   :  { %v1461_v35 = vsub.f32 %v1356_v36, %v4311_v7 }
 0x2d8   :  { %v1462_v40 = vand.u32 4294901760, %v1461_v35 }
 0x2da   :  { %v1463_v59 = vsub.f32 %v1461_v35, %v1462_v40 }
 0x2dc   :  { %v1464_v3 = vand.u32 4294901760, %v1463_v59 }
 0x2de   :  { %2798 = vmatmul.mubr.f32.vlgmr.msra.gmra.mrb[2].mxu0 %v1464_v3 }
 0x2df   :  { %3289 = vmatpush3.bf16.msra.mxu0 %v4236_v39  ;;  %2832 = vmatprep.mubr.msk.f32.mxu0 %vm3498_vm0, %v4472_v14  ;;  %v3360_v39 = vpack.c.bf16 %v1480_v23, %v1473_v22 }
 0x2e0   :  { %3290 = vmatprep.subr.bf16.mxu0 %v4477_v1 }
 0x2e3   :  { %3292 = vmatpush3.bf16.msra.mxu0 %v3291_v53  ;;  %v3363_v53 = vpack.c.bf16 %v1494_v37, %v1487_v62 }
 0x2e4   :  { %3293 = vmatprep.subr.bf16.mxu0 %v4477_v1 }
 0x2e7   :  { %3295 = vmatpush3.bf16.msra.mxu0 %v3294_v60 }
 0x2e8   :  { %3296 = vmatprep.subr.bf16.mxu0 %v4477_v1 }
 0x2eb   :  { %3298 = vmatpush3.bf16.msra.mxu0 %v3297_v2 }
 0x2ec   :  { %3299 = vmatprep.subr.bf16.mxu0 %v4477_v1 }
 0x2ef   :  { %3301 = vmatpush3.bf16.msra.mxu0 %v3300_v0 }
 0x2f0   :  { %3302 = vmatprep.subr.bf16.mxu0 %v4477_v1 }
 0x2f3   :  { %3304 = vmatpush3.bf16.msra.mxu0 %v3303_v26 }
 0x2f4   :  { %3305 = vmatprep.subr.bf16.mxu0 %v4477_v1 }
 0x2f7   :  { %3307 = vmatpush3.bf16.msra.mxu0 %v3306_v38 }
 0x2f8   :  { %3308 = vmatprep.subr.bf16.mxu0 %v4477_v1 }
 0x2fb   :  { %3310 = vmatpush3.bf16.msra.mxu0 %v3309_v52 }
 0x2fc   :  { %3311 = vmatprep.subr.bf16.mxu0 %v4477_v1 }
 0x2fe   :  { %2833 = vmatmul.mubr.f32.vlgmr.msra.gmra.mrb[2].mxu0 %v4311_v7 }
 0x2ff   :  { %3313 = vmatpush3.bf16.msra.mxu0 %v3312_v25  ;;  %2867 = vmatprep.mubr.msk.f32.mxu0 %vm3498_vm0, %v4472_v14 }
 0x300   :  { %3314 = vmatprep.subr.bf16.mxu0 %v4477_v1 }
 0x303   :  { %3316 = vmatpush3.bf16.msra.mxu0 %v3315_v48 }
 0x304   :  { %3317 = vmatprep.subr.bf16.mxu0 %v4477_v1 }
 0x307   :  { %3319 = vmatpush3.bf16.msra.mxu0 %v3318_v61 }
 0x308   :  { %3320 = vmatprep.subr.bf16.mxu0 %v4477_v1 }
 0x30b   :  { %3322 = vmatpush3.bf16.msra.mxu0 %v3321_v43 }
 0x30c   :  { %3323 = vmatprep.subr.bf16.mxu0 %v4477_v1 }
 0x30f   :  { %3325 = vmatpush3.bf16.msra.mxu0 %v3324_v4 }
 0x310   :  { %3326 = vmatprep.subr.bf16.mxu0 %v4477_v1 }
 0x313   :  { %3328 = vmatpush3.bf16.msra.mxu0 %v3327_v17 }
 0x314   :  { %3329 = vmatprep.subr.bf16.mxu0 %v4477_v1 }
 0x317   :  { %3331 = vmatpush3.bf16.msra.mxu0 %v3330_v8 }
 0x318   :  { %3332 = vmatprep.subr.bf16.mxu0 %v4477_v1 }
 0x31b   :  { %3334 = vmatpush3.bf16.msra.mxu0 %v3333_v24 }
 0x31c   :  { %3335 = vmatprep.subr.bf16.mxu0 %v4477_v1 }
 0x31e   :  { %2868 = vmatmul.mubr.f32.vlgmr.msra.gmra.mrb[2].mxu0 %v1461_v35 }
 0x31f   :  { %3337 = vmatpush3.bf16.msra.mxu0 %v4052_v6  ;;  %2902 = vmatprep.mubr.msk.f32.mxu0 %vm3498_vm0, %v4472_v14 }
 0x320   :  { %3338 = vmatprep.subr.bf16.mxu0 %v4477_v1 }
 0x323   :  { %3340 = vmatpush3.bf16.msra.mxu0 %v4060_v63 }
 0x324   :  { %3341 = vmatprep.subr.bf16.mxu0 %v4477_v1 }
 0x327   :  { %3343 = vmatpush3.bf16.msra.mxu0 %v4086_v11 }
 0x328   :  { %3344 = vmatprep.subr.bf16.mxu0 %v4477_v1 }
 0x32b   :  { %3346 = vmatpush3.bf16.msra.mxu0 %v4094_v10 }
 0x32c   :  { %3347 = vmatprep.subr.bf16.mxu0 %v4477_v1 }
 0x32f   :  { %3349 = vmatpush3.bf16.msra.mxu0 %v4102_v16 }
 0x330   :  { %3350 = vmatprep.subr.bf16.mxu0 %v4477_v1 }
 0x333   :  { %3352 = vmatpush3.bf16.msra.mxu0 %v4202_v29 }
 0x334   :  { %3353 = vmatprep.subr.bf16.mxu0 %v4477_v1 }
 0x337   :  { %3355 = vmatpush3.bf16.msra.mxu0 %v4206_v45 }
 0x338   :  { %3356 = vmatprep.subr.bf16.mxu0 %v4477_v1 }
 0x33b   :  { %3358 = vmatpush3.bf16.msra.mxu0 %v4212_v41 }
 0x33c   :  { %3359 = vmatprep.subr.bf16.mxu0 %v4477_v1 }
 0x33e   :  { %2903 = vmatmul.mubr.f32.vlgmr.msra.gmra.mrb[2].mxu0 %v1462_v40 }
 0x33f   :  { %3361 = vmatpush3.bf16.msra.mxu0 %v3360_v39  ;;  %2937 = vmatprep.mubr.msk.f32.mxu0 %vm3498_vm0, %v4472_v14 }
 0x340   :  { %3362 = vmatprep.subr.bf16.mxu0 %v4477_v1 }
 0x343   :  { %3364 = vmatpush3.bf16.msra.mxu0 %v3363_v53 }
 0x344   :  { %3365 = vmatprep.subr.bf16.mxu0 %v4477_v1 }
 0x347   :  { %3367 = vmatpush3.bf16.msra.mxu0 %v3366_v55 }
 0x348   :  { %3368 = vmatprep.subr.bf16.mxu0 %v4477_v1 }
 0x34b   :  { %3370 = vmatpush3.bf16.msra.mxu0 %v3369_v42 }
 0x34c   :  { %3371 = vmatprep.subr.bf16.mxu0 %v4477_v1 }
 0x34f   :  { %3373 = vmatpush3.bf16.msra.mxu0 %v3372_v9 }
 0x350   :  { %3374 = vmatprep.subr.bf16.mxu0 %v4477_v1 }
 0x353   :  { %3376 = vmatpush3.bf16.msra.mxu0 %v3375_v12 }
 0x354   :  { %3377 = vmatprep.subr.bf16.mxu0 %v4477_v1 }
 0x357   :  { %3379 = vmatpush3.bf16.msra.mxu0 %v3378_v19 }
 0x358   :  { %3380 = vmatprep.subr.bf16.mxu0 %v4477_v1 }
 0x35b   :  { %3382 = vmatpush3.bf16.msra.mxu0 %v3381_v27 }
 0x35c   :  { %3383 = vmatprep.subr.bf16.mxu0 %v4477_v1 }
 0x35e   :  { %2938 = vmatmul.mubr.f32.vlgmr.msra.gmra.mrb[2].mxu0 %v4311_v7 }
 0x35f   :  { %3385 = vmatpush3.bf16.msra.mxu0 %v4052_v6  ;;  %2972 = vmatprep.mubr.msk.f32.mxu0 %vm3498_vm0, %v4472_v14  ;;  %v2038_v14 = vld [vmem:[%s4432_s2 + $0x2] ss:$0 sm:$0xff] }
 0x360   :  { %3386 = vmatprep.subr.bf16.mxu0 %v4477_v1 }
 0x363   :  { %3388 = vmatpush3.bf16.msra.mxu0 %v4060_v63 }
 0x364   :  { %3389 = vmatprep.subr.bf16.mxu0 %v4477_v1 }
 0x367   :  { %3391 = vmatpush3.bf16.msra.mxu0 %v4086_v11 }
 0x368   :  { %3392 = vmatprep.subr.bf16.mxu0 %v4477_v1 }
 0x36b   :  { %3394 = vmatpush3.bf16.msra.mxu0 %v4094_v10 }
 0x36c   :  { %3395 = vmatprep.subr.bf16.mxu0 %v4477_v1 }
 0x36f   :  { %3397 = vmatpush3.bf16.msra.mxu0 %v4102_v16 }
 0x370   :  { %3398 = vmatprep.subr.bf16.mxu0 %v4477_v1 }
 0x373   :  { %3400 = vmatpush3.bf16.msra.mxu0 %v4202_v29 }
 0x374   :  { %3401 = vmatprep.subr.bf16.mxu0 %v4477_v1 }
 0x377   :  { %3403 = vmatpush3.bf16.msra.mxu0 %v4206_v45 }
 0x378   :  { %3404 = vmatprep.subr.bf16.mxu0 %v4477_v1 }
 0x37b   :  { %3406 = vmatpush3.bf16.msra.mxu0 %v4212_v41 }
 0x37e   :  { %2973 = vmatmul.mubr.f32.vlgmr.msra.gmra.mrb[2].mxu0 %v4311_v7 }
 0x451   :  { %v2016_v63 = vpop.f32.mrb[2].mxu0 }
 0x452   :  { %v3410_v6 = vadd.f32 %v2038_v14, %v2016_v63  ;;  %v2974_v11 = vpop.f32.mrb[3].mxu0 }
 0x454   :  { %2020 = vst [vmem:[#allocation5] sm:$0xff] %v3410_v6 }
 0x455   :  { %3479 = shalt.err (!%p3476_p12)
}
 0x456   :  { %s3480_s10 = scalar_lea.hbm %s4433_s3, 128 }
 0x457   :  { %p3481_p13 = scmp.ne.s32.totalorder %s4433_s3, %s3480_s10  ;;  %p3484_p0 = scmp.lt.u32.totalorder %s3480_s10, %s4433_s3 }
 0x459   :  { %p3486_p1 = pnand %p3484_p0, %p3481_p13 }
 0x45b   :  { %3489 = shalt.err (!%p3486_p1)
}
 0x45c   :  { %2030 = dma.vmem_to_hbm [thread:$0]  %s2028_s6, 128, %s4433_s3, [#allocation4]  }
 0x45d   :  { %3492 = dma.done.wait [#allocation4], 128  }
 0x45e   :  { %3493 = vsyncadd [#allocation4], 4294967168 }
 0x45f   :  { %2034 = vsyncpa [#allocation3], 1 }
 0x460   :  { %2035 = vsyncpa [#allocation4], 1 }

</bundles_post_ra>
